<compile_context>
chip_gen: v7x
topology: tpu7x:2x2x1
jax: 0.10.0
libtpu: 0.0.40
codegen_flags: <defaults>
</compile_context>

<pallas_src>
import functools

import jax
import jax.numpy as jnp
from jax.experimental import pallas as pl
from jax.experimental.pallas import tpu as pltpu


def _round_up(x, m):
    return (x + m - 1) // m * m


def padded_num_nodes(n):
    """Padded node count: lane-aligned, and K-tile-aligned for large graphs."""
    n_pad = _round_up(max(n, 128), 128)
    if n_pad > 1024:
        n_pad = _round_up(n_pad, 1024)
    return n_pad


def _tiles_for(n_pad):
    """Row tile TM and reduction tile TK (both divide n_pad, TM mult of 8,
    TK mult of 128).  TM <= n_pad/2 so the parallel row axis has >=2 steps
    (megacore); TK bounded so VMEM use does not scale with N."""
    if n_pad > 1024:
        return 256, 1024
    tk = n_pad
    tm = max(64, min(256, n_pad // 2))
    while n_pad % tm:
        tm //= 2
    return tm, tk


def gcn_layer_kernel(a_ref, z_ref, w_ref, b_ref, o_ref, acc_ref, *, apply_relu):
    """One GCN layer, K-tiled:
         acc[rows] += Â[rows, kslab] @ Z[kslab, :]          (f32 accumulation)
         on last k: o[rows] = act( acc @ W + b )
    Â / Z / W are bf16 (MXU fast path); both matmuls accumulate in f32; the
    bias/ReLU epilogue is f32; cast to the output dtype only at the store."""
    k = pl.program_id(1)

    @pl.when(k == 0)
    def _():
        acc_ref[...] = jnp.zeros_like(acc_ref)

    # (TM, TK) @ (TK, D_pad) -> f32 accumulate   [dominant N^2 stream]
    acc_ref[...] += jnp.dot(
        a_ref[...], z_ref[...], preferred_element_type=jnp.float32
    )

    @pl.when(k == pl.num_programs(1) - 1)
    def _():
        az = acc_ref[...].astype(jnp.bfloat16)   # bf16 operand, f32 accumulation
        out = jnp.dot(az, w_ref[...], preferred_element_type=jnp.float32)
        out = out + b_ref[...]
        if apply_relu:
            out = jnp.maximum(out, 0.0)
        o_ref[...] = out.astype(o_ref.dtype)


def _gcn_layer_call(a_hat, z, w, b, *, apply_relu, out_dtype, tm, tk):
    """pallas_call for one GCN layer with a (TM, TK)-tiled Â stream."""
    n_pad = a_hat.shape[0]
    d_pad = z.shape[1]
    o_pad = w.shape[1]
    grid = (n_pad // tm, n_pad // tk)

    out_itemsize = jnp.dtype(out_dtype).itemsize
    flops = 2 * n_pad * n_pad * d_pad + 2 * n_pad * d_pad * o_pad
    bytes_accessed = (
        n_pad * n_pad * a_hat.dtype.itemsize        # Â streamed once
        + (n_pad // tm) * n_pad * d_pad * z.dtype.itemsize  # Z re-read per row tile
        + d_pad * o_pad * w.dtype.itemsize          # weights
        + o_pad * b.dtype.itemsize                  # bias
        + n_pad * o_pad * out_itemsize              # output writeback
    )
    cost = pl.CostEstimate(
        flops=flops, transcendentals=0, bytes_accessed=bytes_accessed
    )

    # VMEM need is N-independent now: double-buffered Â tile + Z slab + small
    # W/b/out tiles + f32 accumulator scratch.  3x headroom, 16 MiB floor
    # (compiler internal scratch), 40 MiB cap (safe on v7x's 64 MiB).
    buf_bytes = (
        2 * tm * tk * a_hat.dtype.itemsize
        + 2 * tk * d_pad * z.dtype.itemsize
        + 2 * d_pad * o_pad * w.dtype.itemsize
        + 2 * o_pad * b.dtype.itemsize
        + 2 * tm * o_pad * out_itemsize
        + tm * d_pad * 4
    )
    vmem_limit = int(min(max(3 * buf_bytes, 16 * 2**20), 40 * 2**20))

    kernel = functools.partial(gcn_layer_kernel, apply_relu=apply_relu)
    return pl.pallas_call(
        kernel,
        out_shape=jax.ShapeDtypeStruct((n_pad, o_pad), out_dtype),
        grid=grid,
        in_specs=[
            pl.BlockSpec((tm, tk), lambda i, k: (i, k)),      # Â tile (streamed)
            pl.BlockSpec((tk, d_pad), lambda i, k: (k, 0)),   # Z K-slab (streamed)
            pl.BlockSpec((d_pad, o_pad), lambda i, k: (0, 0)),  # W (small)
            pl.BlockSpec((1, o_pad), lambda i, k: (0, 0)),      # bias (small)
        ],
        out_specs=pl.BlockSpec((tm, o_pad), lambda i, k: (i, 0)),
        scratch_shapes=[pltpu.VMEM((tm, d_pad), jnp.float32)],
        compiler_params=pltpu.CompilerParams(
            dimension_semantics=("parallel", "arbitrary"),
            vmem_limit_bytes=vmem_limit,
        ),
        cost_estimate=cost,
    )(a_hat, z, w, b)


def gcn_forward_pallas(a_pad, x, w1, b1, w2, b2):
    """Two-layer GCN forward (dropout = identity, eval mode):
         h   = relu(Â @ X @ W1 + b1)
         out = Â @ h @ W2 + b2
    `a_pad` is the pre-padded, pre-cast bf16 Â from prepare_adjacency (built
    once, outside the hot path).  Lane dims (F, H, C) are zero-padded to 128,
    node rows are already padded in a_pad; the result is sliced to (N, C)."""
    n, f = x.shape
    h_dim = w1.shape[1]
    c = w2.shape[1]

    n_pad = a_pad.shape[0]
    tm, tk = _tiles_for(n_pad)

    lane = 128
    f_pad = _round_up(f, lane)
    h_pad = _round_up(h_dim, lane)
    c_pad = _round_up(c, lane)

    # Pad the small per-forward operands (O(N*F), cheap relative to Â).
    x_p = jnp.zeros((n_pad, f_pad), jnp.bfloat16).at[:n, :f].set(
        x.astype(jnp.bfloat16))
    w1_p = jnp.zeros((f_pad, h_pad), jnp.bfloat16).at[:f, :h_dim].set(
        w1.astype(jnp.bfloat16))
    b1_p = jnp.zeros((1, h_pad), jnp.float32).at[:, :h_dim].set(
        b1.reshape(1, -1).astype(jnp.float32))
    w2_p = jnp.zeros((h_pad, c_pad), jnp.bfloat16).at[:h_dim, :c].set(
        w2.astype(jnp.bfloat16))
    b2_p = jnp.zeros((1, c_pad), jnp.float32).at[:, :c].set(
        b2.reshape(1, -1).astype(jnp.float32))

    # Layer 0: GCNConv + ReLU (dropout identity).  h stored bf16: it is the
    # bf16 matmul operand of layer 1, halving its VMEM/HBM footprint.
    # (Padded node rows may get relu(b1) != 0, but the corresponding Â columns
    # are zero, so they are annihilated in layer 1's Â @ h.)
    h = _gcn_layer_call(a_pad, x_p, w1_p, b1_p,
                        apply_relu=True, out_dtype=jnp.bfloat16, tm=tm, tk=tk)
    # Layer 1: final GCNConv, f32 logits.
    out_p = _gcn_layer_call(a_pad, h, w2_p, b2_p,
                            apply_relu=False, out_dtype=jnp.float32, tm=tm, tk=tk)
    return out_p[:n, :c]


def build_normalized_adjacency(edge_idx, n, edge_weight=None):
    """Dense f32 Â = D^{-1/2} (A + I) D^{-1/2}, mirroring GCN._normalize with
    added self-loops (PyG GCNConv default add_self_loops=True)."""
    row, col = edge_idx[0], edge_idx[1]
    if edge_weight is None:
        edge_weight = jnp.ones(row.shape[0], dtype=jnp.float32)
    a = jnp.zeros((n, n), dtype=jnp.float32)
    a = a.at[row, col].add(edge_weight.astype(jnp.float32))
    a = a + jnp.eye(n, dtype=jnp.float32)          # self-loops (weight 1)
    deg = a.sum(axis=1)                            # deg = A @ ones
    deg_inv_sqrt = jnp.where(deg > 0, deg ** -0.5, 0.0)
    return deg_inv_sqrt[:, None] * a * deg_inv_sqrt[None, :]


def prepare_adjacency(a_hat, dtype=jnp.bfloat16):
    """One-time pad + cast of Â for the kernels (hoisted out of the per-forward
    hot path; cache/reuse this across forwards)."""
    n = a_hat.shape[0]
    n_pad = padded_num_nodes(n)
    return jnp.zeros((n_pad, n_pad), dtype).at[:n, :n].set(a_hat.astype(dtype))


def glorot(key, shape):
    fan_in, fan_out = shape
    limit = (6.0 / (fan_in + fan_out)) ** 0.5
    return jax.random.uniform(key, shape, jnp.float32, -limit, limit)


if __name__ == "__main__":
    # Small synthetic problem consistent with GCN(n_features, n_classes, hidden_dimensions=[H])
    N = 32            # number of graph nodes
    F = 16            # n_features
    H = 32            # hidden_dimensions = [32]
    C = 8             # n_classes
    E = 64            # number of edges

    key = jax.random.PRNGKey(0)
    k_x, k_src, k_dst, k_w1, k_w2 = jax.random.split(key, 5)

    features = jax.random.normal(k_x, (N, F), dtype=jnp.float32)
    src = jax.random.randint(k_src, (E,), 0, N)
    dst = jax.random.randint(k_dst, (E,), 0, N)
    edge_idx = jnp.stack([src, dst], axis=0)       # (2, E)

    # Deterministic parameter init (GCNConv: weight (in, out) glorot, bias zeros)
    w1 = glorot(k_w1, (F, H))
    b1 = jnp.zeros((1, H), dtype=jnp.float32)
    w2 = glorot(k_w2, (H, C))
    b2 = jnp.zeros((1, C), dtype=jnp.float32)

    a_hat = build_normalized_adjacency(edge_idx, N)   # f32, module semantics
    a_pad = prepare_adjacency(a_hat)                  # one-time pad + bf16 cast

    out = gcn_forward_pallas(a_pad, features, w1, b1, w2, b2)
    out = jax.block_until_ready(out)

    # Pure-JAX f32 reference of the fused two-layer forward.
    h_ref = jnp.maximum(a_hat @ (features @ w1) + b1, 0.0)
    out_ref = a_hat @ (h_ref @ w2) + b2

    assert out.shape == (N, C)
    assert bool(jnp.all(jnp.isfinite(out)))
    # bf16 storage of Â / X / W / h with f32 accumulation -> modest tolerance.
    assert jnp.allclose(out, out_ref, atol=5e-2, rtol=5e-2)

    print("KERNEL_OK")
</pallas_src>

<mosaic_0001>
module attributes {stable_mosaic.version = 11 : i64} {
  func.func @gcn_layer_kernel(%arg0: i32, %arg1: i32, %arg2: memref<64x128xbf16, #tpu.memory_space<vmem>>, %arg3: memref<128x128xbf16, #tpu.memory_space<vmem>>, %arg4: memref<128x128xbf16, #tpu.memory_space<vmem>>, %arg5: memref<1x128xf32, #tpu.memory_space<vmem>>, %arg6: memref<64x128xbf16, #tpu.memory_space<vmem>>, %arg7: memref<64x128xf32, #tpu.memory_space<vmem>>) attributes {dimension_semantics = [#tpu.dimension_semantics<parallel>, #tpu.dimension_semantics<arbitrary>], iteration_bounds = array<i64: 2, 1>, scalar_prefetch = 0 : i64, scratch_operands = 1 : i64, tpu.core_type = #tpu.core_type<tc>, window_params = [{transform_indices = @transform_0, window_bounds = array<i64: 64, 128>}, {transform_indices = @transform_1, window_bounds = array<i64: 128, 128>}, {pipeline_mode = #tpu.pipeline_mode<synchronous>, transform_indices = @transform_2, window_bounds = array<i64: 128, 128>}, {pipeline_mode = #tpu.pipeline_mode<synchronous>, transform_indices = @transform_3, window_bounds = array<i64: 1, 128>}, {transform_indices = @transform_4, window_bounds = array<i64: 64, 128>}]} {
    %c0_i32 = arith.constant 0 : i32
    %0 = arith.cmpi eq, %arg1, %c0_i32 : i32
    %1 = arith.extui %0 : i1 to i32
    %c0_i32_0 = arith.constant 0 : i32
    %2 = arith.cmpi ne, %1, %c0_i32_0 : i32
    scf.if %2 {
      %cst_10 = arith.constant 0.000000e+00 : f32
      %12 = vector.broadcast %cst_10 : f32 to vector<64x128xf32>
      %c0_11 = arith.constant 0 : index
      %c0_12 = arith.constant 0 : index
      %13 = vector.load %arg7[%c0_11, %c0_12] : memref<64x128xf32, #tpu.memory_space<vmem>>, vector<64x128xf32>
      tpu.vector_store %arg7[%c0_11, %c0_12], %12 {strides = array<i32>} : memref<64x128xf32, #tpu.memory_space<vmem>>, vector<64x128xf32>,
    } else {
    }
    %c0 = arith.constant 0 : index
    %c0_1 = arith.constant 0 : index
    %3 = vector.load %arg7[%c0, %c0_1] : memref<64x128xf32, #tpu.memory_space<vmem>>, vector<64x128xf32>
    %c0_2 = arith.constant 0 : index
    %c0_3 = arith.constant 0 : index
    %4 = vector.load %arg2[%c0_2, %c0_3] : memref<64x128xbf16, #tpu.memory_space<vmem>>, vector<64x128xbf16>
    %c0_4 = arith.constant 0 : index
    %c0_5 = arith.constant 0 : index
    %5 = vector.load %arg3[%c0_4, %c0_5] : memref<128x128xbf16, #tpu.memory_space<vmem>>, vector<128x128xbf16>
    %cst = arith.constant dense<0.000000e+00> : vector<64x128xf32>
    %6 = tpu.matmul %4, %5, %cst {dimension_numbers = #tpu.dot_dimension_numbers<[1], [0], [0], [1], [0, 0, 1, 1], [], []>} : vector<64x128xbf16>, vector<128x128xbf16>, vector<64x128xf32> -> vector<64x128xf32>
    %7 = arith.addf %3, %6 : vector<64x128xf32>
    %c0_6 = arith.constant 0 : index
    %c0_7 = arith.constant 0 : index
    %8 = vector.load %arg7[%c0_6, %c0_7] : memref<64x128xf32, #tpu.memory_space<vmem>>, vector<64x128xf32>
    tpu.vector_store %arg7[%c0_6, %c0_7], %7 {strides = array<i32>} : memref<64x128xf32, #tpu.memory_space<vmem>>, vector<64x128xf32>,
    %c0_i32_8 = arith.constant 0 : i32
    %9 = arith.cmpi eq, %arg1, %c0_i32_8 : i32
    %10 = arith.extui %9 : i1 to i32
    %c0_i32_9 = arith.constant 0 : i32
    %11 = arith.cmpi ne, %10, %c0_i32_9 : i32
    scf.if %11 {
      %c0_10 = arith.constant 0 : index
      %c0_11 = arith.constant 0 : index
      %12 = vector.load %arg7[%c0_10, %c0_11] : memref<64x128xf32, #tpu.memory_space<vmem>>, vector<64x128xf32>
      %13 = arith.truncf %12 : vector<64x128xf32> to vector<64x128xbf16>
      %c0_12 = arith.constant 0 : index
      %c0_13 = arith.constant 0 : index
      %14 = vector.load %arg4[%c0_12, %c0_13] : memref<128x128xbf16, #tpu.memory_space<vmem>>, vector<128x128xbf16>
      %cst_14 = arith.constant dense<0.000000e+00> : vector<64x128xf32>
      %15 = tpu.matmul %13, %14, %cst_14 {dimension_numbers = #tpu.dot_dimension_numbers<[1], [0], [0], [1], [0, 0, 1, 1], [], []>} : vector<64x128xbf16>, vector<128x128xbf16>, vector<64x128xf32> -> vector<64x128xf32>
      %c0_15 = arith.constant 0 : index
      %c0_16 = arith.constant 0 : index
      %16 = vector.load %arg5[%c0_15, %c0_16] : memref<1x128xf32, #tpu.memory_space<vmem>>, vector<1x128xf32>
      %17 = vector.broadcast %16 : vector<1x128xf32> to vector<64x128xf32>
      %18 = arith.addf %15, %17 : vector<64x128xf32>
      %cst_17 = arith.constant 0.000000e+00 : f32
      %19 = vector.broadcast %cst_17 : f32 to vector<64x128xf32>
      %20 = arith.maximumf %18, %19 : vector<64x128xf32>
      %21 = arith.truncf %20 : vector<64x128xf32> to vector<64x128xbf16>
      %c0_18 = arith.constant 0 : index
      %c0_19 = arith.constant 0 : index
      %22 = vector.load %arg6[%c0_18, %c0_19] : memref<64x128xbf16, #tpu.memory_space<vmem>>, vector<64x128xbf16>
      tpu.vector_store %arg6[%c0_18, %c0_19], %21 {strides = array<i32>} : memref<64x128xbf16, #tpu.memory_space<vmem>>, vector<64x128xbf16>,
    } else {
    }
    return
  }
  func.func @transform_0(%arg0: i32, %arg1: i32) -> (i32, i32) {
    %c0_i32 = arith.constant 0 : i32
    return %arg0, %arg1 : i32, i32
  }
  func.func @transform_1(%arg0: i32, %arg1: i32) -> (i32, i32) {
    %c0_i32 = arith.constant 0 : i32
    %c0_i32_0 = arith.constant 0 : i32
    return %arg1, %c0_i32 : i32, i32
  }
  func.func @transform_2(%arg0: i32, %arg1: i32) -> (i32, i32) {
    %c0_i32 = arith.constant 0 : i32
    %c0_i32_0 = arith.constant 0 : i32
    %c0_i32_1 = arith.constant 0 : i32
    return %c0_i32, %c0_i32_0 : i32, i32
  }
  func.func @transform_3(%arg0: i32, %arg1: i32) -> (i32, i32) {
    %c0_i32 = arith.constant 0 : i32
    %c0_i32_0 = arith.constant 0 : i32
    %c0_i32_1 = arith.constant 0 : i32
    return %c0_i32, %c0_i32_0 : i32, i32
  }
  func.func @transform_4(%arg0: i32, %arg1: i32) -> (i32, i32) {
    %c0_i32 = arith.constant 0 : i32
    %c0_i32_0 = arith.constant 0 : i32
    return %arg0, %c0_i32 : i32, i32
  }
}

</mosaic_0001>

<bundles_post_ra>
// kernel: tpu_custom_call.1
= control target key start
LH: loop header
LB: loop body
LE: loop exit
PB: predicated region body
PF: predicated region fallthrough
CT: control target
= control target key end

     0   :  { %9 = vsyncpa [#allocation4], 0  ;;  %s1530_s0 = inlined_call_operand.hbm [shape: bf16[128,128], index: 0, kind: input, shape index: {}]   ;;  %s1531_s1 = inlined_call_operand.hbm [shape: bf16[128,128], index: 1, kind: input, shape index: {}]   ;;  %s1532_s2 = inlined_call_operand.hbm [shape: bf16[128,128], index: 2, kind: input, shape index: {}]   ;;  %s1533_s3 = inlined_call_operand.vmem [shape: f32[1,128], index: 3, kind: input, shape index: {}]   ;;  %s1534_s4 = inlined_call_operand.hbm [shape: bf16[128,128], index: 4, kind: output, shape index: {}]  }
   0x1   :  { %11 = vsyncpa [#allocation4 + $0x1], 0 }
   0x2   :  { %12 = vsyncpa [#allocation7], 0 }
   0x3   :  { %13 = vsyncpa [#allocation5], 0 }
   0x4   :  { %15 = vsyncpa [#allocation5 + $0x1], 0  ;;  %s1253_s15 = smov 0   ;;  %s1255_s16 = smov 0  }
   0x5   :  { %s1257_s17 = smov 0   ;;  %s1259_s18 = smov 0  }
   0x6   :  { %s1261_s19 = smov 0   ;;  %s1263_s20 = smov 0  }
   0x7 LB: > { %s786_s21 = sadd.s32 4294967295, %s1218_s20   ;;  %s787_s22 = sadd.s32 4294967294, %s1218_s20   ;;  %s1218_s20 = sphi %s1263_s20, %s21_s20   ;;  %s1214_s19 = sphi %s1261_s19, %s1556_s19   ;;  %s1210_s18 = sphi %s1259_s18, %s1555_s18   ;;  %s1206_s17 = sphi %s1257_s17, %s1554_s17   ;;  %s1202_s16 = sphi %s1255_s16, %s1553_s16   ;;  %s1198_s15 = sphi %s1253_s15, %s1552_s15  }
   0x8   : > { %p55_p0 = scmp.ne.s32.totalorder %s1202_s16, %s1198_s15  ;;  %p1287_p1 = scmp.eq.s32.totalorder %s786_s21, 0 }
   0x9   : > { %p1291_p2 = scmp.eq.s32.totalorder %s786_s21, 1  ;;  %p153_p3 = scmp.eq.s32.totalorder %s787_s22, 1 }
   0xa   : > { %s1539_s23 = scalar_select %p1287_p1, 1, 0 }
   0xb   : > { %p1297_p4 = por %p1287_p1, %p55_p0  ;;  %p788_p5 = scmp.ge.s32.totalorder %s1218_s20, 1 }
   0xc   : > { %p1302_p6 = por %p153_p3, %p55_p0  ;;  %p160_p7 = scmp.lt.s32.totalorder %s1218_s20, 3 }
   0xd   : > { %s1541_s25 = scalar_select %p1297_p4, 1, 0 }
   0xe   : > { %s1542_s26 = scalar_select %p1302_p6, 1, 0 }
   0xf   : > { %p1307_p8 = pnand %p788_p5, %p160_p7  ;;  %s1220_s28 = smov [#allocation6]  }
  0x10   : > { %s175_s29 = sshll.u32 %s1220_s28, 4  ;;  %s1221_s5 = smov [#allocation8]   ;;  %s1311_s29 = int_to_ptr.vmem [resolvable:$true] %s175_s29 }
  0x11   : > { %p951_p9 = pneg %p1307_p8  ;;  %s188_s6 = sshll.u32 %s1221_s5, 4  ;;  %s1322_s6 = int_to_ptr.vmem [resolvable:$true] %s188_s6 }
  0x12   : > { %s1046_s9 = scalar_lea.hbm %s1531_s1, 1024 }
  0x13   : > { %p1318_p11 = pnand %p951_p9, %p1287_p1  ;;  %p1047_p12 = scmp.ne.s32.totalorder %s1531_s1, %s1046_s9 }
  0x14   : > { %p1053_p5 = scmp.lt.u32.totalorder %s1046_s9, %s1531_s1 }
  0x15   : > { %p1048_p13 = pneg %p1318_p11 }
  0x17   : > { %p1049_p0 = pnand %p1048_p13, %p1047_p12 }
  0x19   : > { %p1050_p3 = pneg %p1049_p0 }
  0x1b   : > { %p1055_p7 = pnand %p1053_p5, %p1050_p3 }
  0x1d   : > { %1058 = shalt.err (!%p1055_p7)
}
  0x1e   : > { %s1059_s14 = scalar_lea.vmem %s1311_s29, 1024  ;;  %p1067_p1 = scmp.lt.s32.totalorder %s1311_s29, %s1311_s29 }
  0x1f   : > { %p1060_p9 = scmp.ne.s32.totalorder %s1311_s29, %s1059_s14  ;;  %p1068_p12 = scmp.lt.s32.totalorder %s1059_s14, %s1059_s14 }
  0x21   : > { %p1062_p10 = pnand %p1060_p9, %p1048_p13  ;;  %p1069_p0 = por %p1068_p12, %p1067_p1 }
  0x23   : > { %p1063_p6 = pneg %p1062_p10 }
  0x25   : > { %p1070_p4 = pnand %p1069_p0, %p1063_p6 }
  0x27   : > { %1073 = shalt.err (!%p1070_p4)
}
  0x28   : > { %s1222_s21 = smov 64   ;;  %s1223_s22 = smov 4  }
  0x29   : > { %954 = dma.hbm_to_vmem [thread:$0]  (!%p1318_p11), %s1531_s1, 1024, %s1311_s29, [#allocation7], %s1222_s21, %s1222_s21, %s1223_s22  }
  0x2a   : > { %s1074_s9 = scalar_lea.hbm %s1532_s2, 1024 }
  0x2b   : > { %p1075_p1 = scmp.ne.s32.totalorder %s1532_s2, %s1074_s9  ;;  %p1081_p10 = scmp.lt.u32.totalorder %s1074_s9, %s1532_s2 }
  0x2d   : > { %p1077_p4 = pnand %p1075_p1, %p1048_p13 }
  0x2f   : > { %p1078_p6 = pneg %p1077_p4 }
  0x31   : > { %p1083_p3 = pnand %p1081_p10, %p1078_p6 }
  0x33   : > { %1086 = shalt.err (!%p1083_p3)
}
  0x34   : > { %s1087_s29 = scalar_lea.vmem %s1322_s6, 1024  ;;  %p1095_p12 = scmp.lt.s32.totalorder %s1322_s6, %s1322_s6 }
  0x35   : > { %p1088_p5 = scmp.ne.s32.totalorder %s1322_s6, %s1087_s29  ;;  %p1096_p0 = scmp.lt.s32.totalorder %s1087_s29, %s1087_s29 }
  0x37   : > { %p1090_p7 = pnand %p1088_p5, %p1048_p13  ;;  %p1097_p1 = por %p1096_p0, %p1095_p12 }
  0x39   : > { %p1091_p9 = pneg %p1090_p7 }
  0x3b   : > { %p1098_p4 = pnand %p1097_p1, %p1091_p9 }
  0x3d   : > { %1101 = shalt.err (!%p1098_p4)
}
  0x3e   : > { %957 = dma.hbm_to_vmem [thread:$0]  (!%p1318_p11), %s1532_s2, 1024, %s1322_s6, [#allocation7], %s1222_s21, %s1222_s21, %s1223_s22  }
  0x3f   : > { %s33_s30 = sadd.s32 1, %s1214_s19  ;;  %s42_s5 = sadd.s32 1, %s1206_s17 }
  0x40   : > { %p35_p13 = scmp.ge.s32.totalorder %s33_s30, 2  ;;  %p49_p6 = scmp.ne.s32.totalorder %s1206_s17, %s1202_s16 }
  0x41   : > { %p50_p10 = scmp.eq.s32.totalorder %s1218_s20, 0  ;;  %p968_p3 = scmp.lt.s32.totalorder %s1218_s20, 2 }
  0x42   : > { %s1558_s30 = smov (%p35_p13, %s33_s30), 0  ;;  %p1392_p7 = por %p1291_p2, %p49_p6 }
  0x43   : > { %p51_p5 = por %p50_p10, %p49_p6  ;;  %s37_s8 = ssub.s32 %s1214_s19, %s1558_s30 }
  0x44   : > { %s1545_s7 = scalar_select %p1392_p7, 1, 0 }
  0x45   : > { %s205_s9 = sand.u32 1, %s1206_s17   ;;  %p40_p9 = scmp.eq.s32.totalorder %s37_s8, 0 }
  0x46   : > { %s792_s6 = sshll.u32 %s205_s9, 5  ;;  %s834_s10 = sshll.u32 %s1214_s19, 9 }
  0x47   : > { %s1401_s11 = scalar_select %p40_p9, %s1206_s17, %s42_s5  }
  0x48   : > { %s1406_s29 = scalar_lea.hbm %s1530_s0, %s834_s10  ;;  %s209_s24 = scalar_lea.vmem [#allocation3], %s792_s6 }
  0x49   : > { %s217_s14 = sshll.u32 %s209_s24, 4  ;;  %p1410_p2 = pnand %p968_p3, %p51_p5  ;;  %s1414_s14 = int_to_ptr.vmem [resolvable:$true] %s217_s14 }
  0x4a   : > { %s1416_s5 = scalar_lea.sflag [#allocation4], %s205_s9  ;;  %s1102_s8 = scalar_lea.hbm %s1406_s29, 512 }
  0x4b   : > { %p1103_p11 = scmp.ne.s32.totalorder %s1406_s29, %s1102_s8  ;;  %p1104_p12 = pneg %p1410_p2 }
  0x4c   : > { %s1107_s12 = scalar_lea.hbm %s1530_s0, 1024  ;;  %p1108_p4 = scmp.lt.u32.totalorder %s1406_s29, %s1530_s0 }
  0x4d   : > { %p1105_p0 = pnand %p1104_p12, %p1103_p11  ;;  %p1109_p13 = scmp.lt.u32.totalorder %s1107_s12, %s1102_s8 }
  0x4e   : > { %p1111_p10 = scmp.lt.u32.totalorder %s1102_s8, %s1406_s29 }
  0x4f   : > { %p1106_p1 = pneg %p1105_p0  ;;  %p1110_p6 = por %p1109_p13, %p1108_p4 }
  0x51   : > { %p1112_p3 = por %p1111_p10, %p1110_p6 }
  0x53   : > { %p1113_p5 = pnand %p1112_p3, %p1106_p1 }
  0x55   : > { %1116 = shalt.err (!%p1113_p5)
}
  0x56   : > { %s1117_s9 = scalar_lea.vmem %s1414_s14, 512  ;;  %s1224_s6 = smov [#allocation3]  }
  0x57   : > { %p1118_p9 = scmp.ne.s32.totalorder %s1414_s14, %s1117_s9  ;;  %s1122_s10 = sshll.u32 %s1224_s6, 4  ;;  %s1123_s10 = int_to_ptr.vmem [resolvable:$false] %s1122_s10 }
  0x58   : > { %s1124_s13 = scalar_lea.vmem %s1123_s10, 1024  ;;  %p1125_p7 = scmp.lt.s32.totalorder %s1414_s14, %s1123_s10 }
  0x59   : > { %p1120_p11 = pnand %p1118_p9, %p1104_p12  ;;  %p1126_p4 = scmp.lt.s32.totalorder %s1124_s13, %s1117_s9 }
  0x5b   : > { %p1121_p0 = pneg %p1120_p11  ;;  %p1127_p13 = por %p1126_p4, %p1125_p7 }
  0x5d   : > { %p1128_p6 = pnand %p1127_p13, %p1121_p0 }
  0x5f   : > { %1131 = shalt.err (!%p1128_p6)
}
  0x60   : > { %961 = dma.hbm_to_vmem [thread:$0]  (!%p1410_p2), %s1406_s29, 512, %s1414_s14, %s1416_s5, %s1222_s21, %s1222_s21, %s1223_s22  }
  0x61   : > { %229 = sbr.rel (%p1307_p8) target bundleno = 603 (0x25b), region = 36  ;;  %s1450_s8 = sand.u32 (!%p1307_p8), 1, %s1202_s16  }
  0x62   : > { %s796_s12 = sshll.u32 (!%p1307_p8), %s1450_s8, 5  ;;  %s232_s24 = scalar_lea.sflag (!%p1307_p8), [#allocation4], %s1450_s8 }
  0x63   : > { %s1456_s28 = scalar_lea.vmem (!%p1307_p8), [#allocation3], %s796_s12  ;;  %p1547_p7 = scmp.ne.s32.totalorder (!%p1307_p8), %s1541_s25, 0 }
  0x68   : > { %1185 = dma.done.wait (%p1547_p7), %s232_s24, 512  }
  0x69   : > { %1187 = vsyncadd (%p1547_p7), %s232_s24, 4294966784  ;;  %p1548_p2 = scmp.ne.s32.totalorder %s1539_s23, 0 }
  0x6b   : > { %1189 = dma.done.wait (%p1548_p2), [#allocation7], 2048  }
  0x6c   : > { %1191 = vsyncadd (%p1548_p2), [#allocation7], 4294965248  ;;  %v1026_v0 = vld [vmem:[#allocation6] sm:$0xff]   ;;  %v1027_v1 = vld [vmem:[#allocation6 + $0x8] sm:$0xff]   ;;  %s267_s27 = scalar_lea.vmem [#allocation9], %s796_s12  ;;  %s843_s22 = sshll.u32 %s1210_s18, 9 }
  0x6d   : > { %891 = vmatprep.subr.bf16.mxu0 %v1026_v0  ;;  %v1028_v2 = vld [vmem:[#allocation6 + $0x10] sm:$0xff]   ;;  %v1029_v3 = vld [vmem:[#allocation6 + $0x18] sm:$0xff]   ;;  %v1034_v4 = vld [vmem:[%s1456_s28] sm:$0xff]   ;;  %s682_s21 = sshll.u32 %s267_s27, 4  ;;  %s1481_s5 = scalar_lea.hbm %s1534_s4, %s843_s22  ;;  %s1476_s21 = int_to_ptr.vmem [resolvable:$true] %s682_s21 }
  0x6e   : > { %892 = vmatpush3.bf16.msra.mxu0 %v1026_v0  ;;  %907 = vmatprep.mubr.bf16.mxu0 %v1034_v4  ;;  %v1030_v5 = vld [vmem:[#allocation6 + $0x20] sm:$0xff]   ;;  %v1039_v7 = vld [vmem:[#allocation8 + $0x8] sm:$0xff]   ;;  %v1040_v9 = vld [vmem:[#allocation8 + $0x10] sm:$0xff]   ;;  %s669_s9 = scalar_lea.sflag [#allocation5], %s1450_s8  ;;  %s1132_s18 = scalar_lea.vmem %s1476_s21, 512 }
  0x6f   : > { %893 = vmatprep.subr.bf16.mxu0 %v1027_v1  ;;  %v1038_v6 = vld [vmem:[#allocation8] sm:$0xff]   ;;  %v1031_v8 = vld [vmem:[#allocation6 + $0x28] sm:$0xff]   ;;  %v1032_v10 = vld [vmem:[#allocation6 + $0x30] sm:$0xff]   ;;  %p1133_p8 = scmp.ne.s32.totalorder %s1476_s21, %s1132_s18  ;;  %p1549_p12 = scmp.ne.s32.totalorder %s1545_s7, 0 }
  0x70   : > { %915 = vmatprep.subr.bf16.mxu1 %v1038_v6  ;;  %v1041_v11 = vld [vmem:[#allocation8 + $0x18] sm:$0xff]   ;;  %v1042_v13 = vld [vmem:[#allocation8 + $0x20] sm:$0xff]   ;;  %v1043_v14 = vld [vmem:[#allocation8 + $0x28] sm:$0xff]   ;;  %s1225_s6 = smov [#allocation9]  }
  0x71   : > { %916 = vmatpush3.bf16.msra.mxu1 %v1038_v6  ;;  %v1033_v12 = vld [vmem:[#allocation6 + $0x38] sm:$0xff]   ;;  %v1035_v15 = vld [vmem:[%s1456_s28 + $0x8] sm:$0xff]   ;;  %v1036_v16 = vld [vmem:[%s1456_s28 + $0x10] sm:$0xff]   ;;  %p1134_p1 = pnand %p1133_p8, %p1549_p12  ;;  %s1136_s10 = sshll.u32 %s1225_s6, 4  ;;  %s1137_s10 = int_to_ptr.vmem [resolvable:$false] %s1136_s10 }
  0x72   : > { %894 = vmatpush3.bf16.msra.mxu0 %v1027_v1  ;;  %917 = vmatprep.subr.bf16.mxu1 %v1039_v7  ;;  %v1044_v17 = vld [vmem:[#allocation8 + $0x30] sm:$0xff]   ;;  %v1037_v18 = vld [vmem:[%s1456_s28 + $0x18] sm:$0xff]   ;;  %v812_v32 = vld [vmem:[%s1533_s3] ss:$0 sm:$0xff]  ;;  %s1138_s13 = scalar_lea.vmem %s1137_s10, 1024  ;;  %p1139_p3 = scmp.lt.s32.totalorder %s1476_s21, %s1137_s10 }
  0x73   : > { %895 = vmatprep.subr.bf16.mxu0 %v1028_v2  ;;  %v1045_v19 = vld [vmem:[#allocation8 + $0x38] sm:$0xff]   ;;  %p1135_p10 = pneg %p1134_p1  ;;  %p1140_p5 = scmp.lt.s32.totalorder %s1138_s13, %s1132_s18 }
  0x75   : > { %918 = vmatpush3.bf16.msra.mxu1 %v1039_v7  ;;  %p1141_p9 = por %p1140_p5, %p1139_p3 }
  0x76   : > { %896 = vmatpush3.bf16.msra.mxu0 %v1028_v2  ;;  %919 = vmatprep.subr.bf16.mxu1 %v1040_v9 }
  0x77   : > { %897 = vmatprep.subr.bf16.mxu0 %v1029_v3  ;;  %p1142_p11 = pnand %p1141_p9, %p1135_p10 }
  0x79   : > { %920 = vmatpush3.bf16.msra.mxu1 %v1040_v9 }
  0x7a   : > { %898 = vmatpush3.bf16.msra.mxu0 %v1029_v3  ;;  %921 = vmatprep.subr.bf16.mxu1 %v1041_v11 }
  0x7b   : > { %899 = vmatprep.subr.bf16.mxu0 %v1030_v5 }
  0x7d   : > { %922 = vmatpush3.bf16.msra.mxu1 %v1041_v11 }
  0x7e   : > { %900 = vmatpush3.bf16.msra.mxu0 %v1030_v5  ;;  %923 = vmatprep.subr.bf16.mxu1 %v1042_v13 }
  0x7f   : > { %901 = vmatprep.subr.bf16.mxu0 %v1031_v8 }
  0x81   : > { %924 = vmatpush3.bf16.msra.mxu1 %v1042_v13 }
  0x82   : > { %902 = vmatpush3.bf16.msra.mxu0 %v1031_v8  ;;  %925 = vmatprep.subr.bf16.mxu1 %v1043_v14 }
  0x83   : > { %903 = vmatprep.subr.bf16.mxu0 %v1032_v10 }
  0x85   : > { %926 = vmatpush3.bf16.msra.mxu1 %v1043_v14 }
  0x86   : > { %904 = vmatpush3.bf16.msra.mxu0 %v1032_v10  ;;  %927 = vmatprep.subr.bf16.mxu1 %v1044_v17 }
  0x87   : > { %905 = vmatprep.subr.bf16.mxu0 %v1033_v12 }
  0x89   : > { %928 = vmatpush3.bf16.msra.mxu1 %v1044_v17 }
  0x8a   : > { %906 = vmatpush3.bf16.msra.mxu0 %v1033_v12  ;;  %929 = vmatprep.subr.bf16.mxu1 %v1045_v19 }
  0x8d   : > { %908 = vmatmul.mubr.bf16.vlgmr.msra.gmra.mrb[0].mxu0 %v1035_v15  ;;  %930 = vmatpush3.bf16.msra.mxu1 %v1045_v19 }
  0x8e   : > { %911 = vmatprep.mubr.bf16.mxu0 %v1036_v16 }
  0x95   : > { %912 = vmatmul.mubr.bf16.gmra.mrb[4].mxu0 %v1037_v18 }
 0x160   : > { %v909_v20 = vpop.f32.mrb[0].mxu0 }
 0x161   : > { %v422_v21 = vpop.f32.mrb[1].mxu0 }
 0x162   : > { %v910_v22 = vpop.f32.mrb[2].mxu0 }
 0x163   : > { %v481_v23 = vpack.c.bf16 %v910_v22, %v909_v20  ;;  %v425_v24 = vpop.f32.mrb[3].mxu0 }
 0x164   : > { %v480_v25 = vpack.c.bf16 %v425_v24, %v422_v21 }
 0x166   : > { %931 = vmatprep.mubr.bf16.mxu1 %v480_v25 }
 0x167   : > { %932 = vmatmul.mubr.bf16.vlgmr.msra.gmra.mrb[0].mxu1 %v481_v23 }
 0x168   : > { %v913_v26 = vpop.f32.mrb[4].mxu0 }
 0x169   : > { %v438_v27 = vpop.f32.mrb[5].mxu0 }
 0x16a   : > { %v914_v28 = vpop.f32.mrb[6].mxu0 }
 0x16b   : > { %v483_v29 = vpack.c.bf16 %v914_v28, %v913_v26  ;;  %v441_v30 = vpop.f32.mrb[7].mxu0 }
 0x16c   : > { %v482_v31 = vpack.c.bf16 %v441_v30, %v438_v27 }
 0x16e   : > { %935 = vmatprep.mubr.bf16.mxu1 %v482_v31 }
 0x16f   : > { %936 = vmatmul.mubr.bf16.gmra.mrb[4].mxu1 %v483_v29 }
 0x23a   : > { %v933_v33 = vpop.f32.mrb[0].mxu1 }
 0x23b   : > { %v598_v34 = vadd.f32 %v933_v33, %v812_v32  ;;  %v589_v35 = vpop.f32.mrb[1].mxu1 }
 0x23c   : > { %v590_v36 = vadd.f32 %v812_v32, %v589_v35  ;;  %v934_v37 = vpop.f32.mrb[2].mxu1 }
 0x23d   : > { %v601_v38 = vadd.f32 %v934_v37, %v812_v32  ;;  %v592_v39 = vpop.f32.mrb[3].mxu1  ;;  %v622_v41 = vmax.f32 %v598_v34, 0.0 }
 0x23e   : > { %v593_v40 = vadd.f32 %v812_v32, %v592_v39  ;;  %v620_v43 = vmax.f32 %v590_v36, 0.0 }
 0x23f   : > { %v623_v42 = vmax.f32 %v601_v38, 0.0 }
 0x240   : > { %v621_v44 = vmax.f32 %v593_v40, 0.0 }
 0x241   : > { %v852_v45 = vpack.c.bf16 %v623_v42, %v622_v41 }
 0x242   : > { %v847_v46 = vpack.c.bf16 %v621_v44, %v620_v43  ;;  %v937_v47 = vpop.f32.mrb[4].mxu1 }
 0x243   : > { %864 = vst [vmem:[%s267_s27 + $0x8] sm:$0xff] %v852_v45   ;;  %v614_v48 = vadd.f32 %v937_v47, %v812_v32  ;;  %v605_v49 = vpop.f32.mrb[5].mxu1 }
 0x244   : > { %848 = vst [vmem:[%s267_s27] sm:$0xff] %v847_v46   ;;  %v606_v50 = vadd.f32 %v812_v32, %v605_v49  ;;  %v938_v51 = vpop.f32.mrb[6].mxu1 }
 0x245   : > { %v617_v52 = vadd.f32 %v938_v51, %v812_v32  ;;  %v608_v53 = vpop.f32.mrb[7].mxu1  ;;  %v626_v55 = vmax.f32 %v614_v48, 0.0 }
 0x246   : > { %v609_v54 = vadd.f32 %v812_v32, %v608_v53  ;;  %v624_v57 = vmax.f32 %v606_v50, 0.0 }
 0x247   : > { %v627_v56 = vmax.f32 %v617_v52, 0.0 }
 0x248   : > { %v625_v58 = vmax.f32 %v609_v54, 0.0 }
 0x249   : > { %v862_v59 = vpack.c.bf16 %v627_v56, %v626_v55 }
 0x24a   : > { %v857_v60 = vpack.c.bf16 %v625_v58, %v624_v57 }
 0x24b   : > { %866 = vst [vmem:[%s267_s27 + $0x18] sm:$0xff] %v862_v59  }
 0x24c   : > { %865 = vst [vmem:[%s267_s27 + $0x10] sm:$0xff] %v857_v60  }
 0x24d   : > { %1145 = shalt.err (!%p1142_p11)
}
 0x24e   : > { %s1146_s12 = scalar_lea.hbm %s1481_s5, 512  ;;  %s1150_s23 = scalar_lea.hbm %s1534_s4, 1024 }
 0x24f   : > { %p1147_p0 = scmp.ne.s32.totalorder %s1481_s5, %s1146_s12  ;;  %p1151_p6 = scmp.lt.u32.totalorder %s1481_s5, %s1534_s4 }
 0x250   : > { %p1152_p7 = scmp.lt.u32.totalorder %s1150_s23, %s1146_s12  ;;  %p1154_p8 = scmp.lt.u32.totalorder %s1146_s12, %s1481_s5 }
 0x251   : > { %p1148_p4 = pnand %p1147_p0, %p1549_p12 }
 0x252   : > { %p1153_p2 = por %p1152_p7, %p1151_p6 }
 0x253   : > { %p1149_p13 = pneg %p1148_p4 }
 0x254   : > { %p1155_p1 = por %p1154_p8, %p1153_p2 }
 0x256   : > { %p1156_p10 = pnand %p1155_p1, %p1149_p13 }
 0x258   : > { %1159 = shalt.err (!%p1156_p10)
}
 0x259   : > { %s1226_s22 = smov 64   ;;  %s1227_s29 = smov 4  }
 0x25a   : > { %949 = dma.vmem_to_hbm [thread:$0]  (%p1549_p12), %s1476_s21, 512, %s1481_s5, %s669_s9, %s1226_s22, %s1226_s22, %s1227_s29  }
 0x25b PF: > { %s697_s14 = sand.u32 1, %s1198_s15   ;;  %p1550_p3 = scmp.ne.s32.totalorder %s1542_s26, 0 }
 0x25c   : > { %p1551_p5 = scmp.ge.s32.totalorder %s1218_s20, 2  ;;  %s698_s18 = scalar_lea.sflag [#allocation5], %s697_s14 }
 0x25e   : > { %p963_p9 = pnand %p1551_p5, %p1550_p3 }
 0x260   : > { %1193 = dma.done.wait (!%p963_p9), %s698_s18, 512  }
 0x261   : > { %1195 = vsyncadd (!%p963_p9), %s698_s18, 4294966784  ;;  %s21_s20 = sadd.s32 1, %s1218_s20   ;;  %s1552_s15 = smov %s1202_s16 }
 0x262   : > { %p18_p11 = scmp.ge.s32.totalorder %s21_s20, 4   ;;  %s1553_s16 = smov %s1206_s17 }
 0x263   : > { %s1554_s17 = smov %s1401_s11  ;;  %s1555_s18 = smov %s1214_s19 }
 0x264   : > { %s1556_s19 = smov %s1558_s30  ;;  %20 = sbr.rel (!%p18_p11) target bundleno = 7 (0x7), region = 98 }
 0x26b   :  { %703 = vsyncpa [#allocation4], 1 }
 0x26c   :  { %705 = vsyncpa [#allocation4 + $0x1], 1 }
 0x26d   :  { %706 = vsyncpa [#allocation7], 1 }
 0x26e   :  { %707 = vsyncpa [#allocation5], 1 }
 0x26f   :  { %709 = vsyncpa [#allocation5 + $0x1], 1 }

</bundles_post_ra>
